<compile_context>
chip_gen: v7x
topology: tpu7x:2x2x1
jax: 0.10.0
libtpu: 0.0.40
codegen_flags: <defaults>
</compile_context>

<pallas_src>
import functools

import jax
import jax.numpy as jnp
from jax.experimental import pallas as pl
from jax.experimental.pallas import tpu as pltpu

LN_EPS = 1e-5
COS_EPS = 1e-6
NEG_BIG = -1e30                      # finite "-inf" for the running max (avoids inf-inf NaNs)
TARGET_TILE_BYTES = 1 * 1024 * 1024  # ~1 MiB row tiles: amortize per-step overhead, tiny VMEM
VMEM_LIMIT_BYTES = 32 * 1024 * 1024  # explicit budget, safe on v5e/v6e (128 MiB) and v7x (64 MiB)


def _phase_a_kernel(x1_ref, x2_ref, gamma_ref, beta_ref,
                    w1_ref, b1_ref, w2_ref, b2_ref,
                    w1x_ref, w2x_ref,
                    m_ref, l_ref, acc1_ref, acc2_ref,
                    *, n_rows, tile_n, need_mask):
    t = pl.program_id(0)

    @pl.when(t == 0)
    def _init():
        m_ref[...] = jnp.full_like(m_ref, NEG_BIG)
        l_ref[...] = jnp.zeros_like(l_ref)
        acc1_ref[...] = jnp.zeros_like(acc1_ref)
        acc2_ref[...] = jnp.zeros_like(acc2_ref)

    x1 = x1_ref[...]                 # (tile_n, D)
    x2 = x2_ref[...]                 # (tile_n, D)
    gamma = gamma_ref[...]           # (1, D)
    beta = beta_ref[...]             # (1, D)

    def layer_norm(x):
        mu = jnp.mean(x, axis=-1, keepdims=True)
        var = jnp.mean(jnp.square(x - mu), axis=-1, keepdims=True)
        return (x - mu) * jax.lax.rsqrt(var + LN_EPS) * gamma + beta

    # Small (tile_n, D) @ (D, D//4) projections — noise vs. HBM traffic, leave on MXU.
    h1 = jnp.dot(layer_norm(x1), w1_ref[...],
                 preferred_element_type=jnp.float32) + b1_ref[...]
    h2 = jnp.dot(layer_norm(x2), w2_ref[...],
                 preferred_element_type=jnp.float32) + b2_ref[...]

    dotp = jnp.sum(h1 * h2, axis=-1, keepdims=True)
    n1sq = jnp.sum(h1 * h1, axis=-1, keepdims=True)
    n2sq = jnp.sum(h2 * h2, axis=-1, keepdims=True)
    # dot / max(|h1||h2|, eps) == dot * rsqrt(max(|h1|^2 |h2|^2, eps^2)); rsqrt -> EUP slot.
    # TODO(synk): matches the module's math; torch's current CosineSimilarity clamps
    # slightly differently for near-zero-norm rows only.
    cos = dotp * jax.lax.rsqrt(jnp.maximum(n1sq * n2sq, COS_EPS * COS_EPS))  # (tile_n, 1)

    if need_mask:  # padded rows must not contribute to the global softmax
        row = t * tile_n + jax.lax.broadcasted_iota(jnp.int32, (tile_n, 1), 0)
        cos = jnp.where(row < n_rows, cos, NEG_BIG)

    # Online softmax over the full length-N vector, fused with the weighted row-sums.
    m_old = m_ref[...]                                            # (1, 1)
    m_new = jnp.maximum(m_old, jnp.max(cos, axis=0, keepdims=True))
    alpha = jnp.exp(m_old - m_new)                                # (1, 1)
    e = jnp.exp(cos - m_new)                                      # (tile_n, 1)

    l_ref[...] = alpha * l_ref[...] + jnp.sum(e, axis=0, keepdims=True)
    acc1_ref[...] = alpha * acc1_ref[...] + jnp.sum(e * x1, axis=0, keepdims=True)
    acc2_ref[...] = alpha * acc2_ref[...] + jnp.sum(e * x2, axis=0, keepdims=True)
    m_ref[...] = m_new

    @pl.when(t == pl.num_programs(0) - 1)
    def _finalize():
        inv_l = 1.0 / l_ref[...]     # exact; runs once per call on a (1, D) vector
        w1x_ref[...] = (acc1_ref[...] * inv_l).astype(w1x_ref.dtype)
        w2x_ref[...] = (acc2_ref[...] * inv_l).astype(w2x_ref.dtype)


def _residual_add_kernel(w1_ref, w2_ref, x1_ref, x2_ref, o1_ref, o2_ref):
    # Lane-dense broadcast residual add; outputs alias inputs (in-place).
    o1_ref[...] = (x1_ref[...] + w1_ref[...]).astype(o1_ref.dtype)
    o2_ref[...] = (x2_ref[...] + w2_ref[...]).astype(o2_ref.dtype)


def _round_up(v, m):
    return ((v + m - 1) // m) * m


@jax.jit
def simple_cross_attention(x1, x2, gamma, beta, w1, b1, w2, b2):
    """x1, x2: (N, D). w1, w2: (D//4, D) PyTorch-style Linear weights."""
    N, D = x1.shape
    Dh = w1.shape[0]

    gamma2 = gamma.reshape(1, D).astype(jnp.float32)
    beta2 = beta.reshape(1, D).astype(jnp.float32)
    w1t = w1.T.astype(jnp.float32)                    # (D, Dh)
    w2t = w2.T.astype(jnp.float32)
    b1_2 = b1.reshape(1, Dh).astype(jnp.float32)
    b2_2 = b2.reshape(1, Dh).astype(jnp.float32)

    # ------------- Phase A: online softmax(cos) @ x reduction over row tiles -------------
    rows = max(8, (TARGET_TILE_BYTES // (D * 4) // 8) * 8)     # ~1 MiB per input tile
    tile_n = min(rows, _round_up(N, 8))
    n_pad = _round_up(N, tile_n)
    if n_pad != N:
        x1p = jnp.pad(x1, ((0, n_pad - N), (0, 0)))
        x2p = jnp.pad(x2, ((0, n_pad - N), (0, 0)))
    else:
        x1p, x2p = x1, x2
    num_tiles = n_pad // tile_n

    kernel_a = functools.partial(
        _phase_a_kernel, n_rows=N, tile_n=tile_n, need_mask=(n_pad != N))

    row_spec = pl.BlockSpec((tile_n, D), lambda t: (t, 0))
    vec_d_spec = pl.BlockSpec((1, D), lambda t: (0, 0))
    mat_spec = pl.BlockSpec((D, Dh), lambda t: (0, 0))
    vec_dh_spec = pl.BlockSpec((1, Dh), lambda t: (0, 0))

    cost_a = pl.CostEstimate(
        flops=int(N * (4 * D * Dh + 24 * D)),
        transcendentals=int(4 * N),
        bytes_accessed=int(4 * (2 * n_pad * D + 2 * D * Dh + 6 * D + 2 * Dh)))

    w1x, w2x = pl.pallas_call(
        kernel_a,
        grid=(num_tiles,),
        in_specs=[row_spec, row_spec, vec_d_spec, vec_d_spec,
                  mat_spec, vec_dh_spec, mat_spec, vec_dh_spec],
        out_specs=[vec_d_spec, vec_d_spec],
        out_shape=(jax.ShapeDtypeStruct((1, D), jnp.float32),
                   jax.ShapeDtypeStruct((1, D), jnp.float32)),
        scratch_shapes=[pltpu.VMEM((1, 1), jnp.float32),   # running max m
                        pltpu.VMEM((1, 1), jnp.float32),   # running denom l
                        pltpu.VMEM((1, D), jnp.float32),   # acc for sim @ x1
                        pltpu.VMEM((1, D), jnp.float32)],  # acc for sim @ x2
        compiler_params=pltpu.CompilerParams(
            dimension_semantics=("arbitrary",),            # sequential reduction axis
            vmem_limit_bytes=VMEM_LIMIT_BYTES),
        cost_estimate=cost_a,
    )(x1p, x2p, gamma2, beta2, w1t, b1_2, w2t, b2_2)

    # ------------- Phase B: lane-dense in-place residual broadcast-add -------------
    if D <= 128 and 128 % D == 0 and (N * D) % 128 == 0:
        rep, L = 128 // D, 128
        x1s = x1.reshape(-1, L)
        x2s = x2.reshape(-1, L)
        wadd1 = jnp.tile(w1x, (1, rep)).astype(x1.dtype)   # (1, 128)
        wadd2 = jnp.tile(w2x, (1, rep)).astype(x2.dtype)
    else:                                                  # fallback: natural layout
        rep, L = 1, D
        x1s, x2s = x1, x2
        wadd1 = w1x.astype(x1.dtype)
        wadd2 = w2x.astype(x2.dtype)
    S = x1s.shape[0]

    rows_b = max(8, (TARGET_TILE_BYTES // (L * 4) // 8) * 8)
    br = min(rows_b, S)                                    # full dim if small, else mult of 8

    vec_l_spec = pl.BlockSpec((1, L), lambda t: (0, 0))
    slab_spec = pl.BlockSpec((br, L), lambda t: (t, 0))

    cost_b = pl.CostEstimate(
        flops=int(2 * S * L),
        transcendentals=0,
        bytes_accessed=int(4 * (4 * S * L + 2 * L)))

    o1s, o2s = pl.pallas_call(
        _residual_add_kernel,
        grid=(pl.cdiv(S, br),),
        in_specs=[vec_l_spec, vec_l_spec, slab_spec, slab_spec],
        out_specs=[slab_spec, slab_spec],
        out_shape=(jax.ShapeDtypeStruct((S, L), x1.dtype),
                   jax.ShapeDtypeStruct((S, L), x2.dtype)),
        input_output_aliases={2: 0, 3: 1},                 # write x1s/x2s in place
        compiler_params=pltpu.CompilerParams(
            dimension_semantics=("parallel",),             # megacore-shardable on v7x
            vmem_limit_bytes=VMEM_LIMIT_BYTES),
        cost_estimate=cost_b,
    )(wadd1, wadd2, x1s, x2s)

    return o1s.reshape(N, D), o2s.reshape(N, D)


def reference(x1, x2, gamma, beta, w1, b1, w2, b2):
    """Plain-JAX reference mirroring the PyTorch forward."""
    def ln(x):
        mu = jnp.mean(x, axis=-1, keepdims=True)
        var = jnp.mean((x - mu) ** 2, axis=-1, keepdims=True)
        return (x - mu) / jnp.sqrt(var + LN_EPS) * gamma + beta

    h1 = ln(x1) @ w1.T + b1
    h2 = ln(x2) @ w2.T + b2
    cos = jnp.sum(h1 * h2, axis=1) / jnp.maximum(
        jnp.linalg.norm(h1, axis=1) * jnp.linalg.norm(h2, axis=1), COS_EPS)
    sim = jax.nn.softmax(cos, axis=-1)                     # (N,)
    return sim @ x1 + x1, sim @ x2 + x2


if __name__ == "__main__":
    def make_inputs(key, n, d):
        dh = d // 4
        k1, k2, k3, k4, k5, k6 = jax.random.split(key, 6)
        x1 = jax.random.normal(k1, (n, d), dtype=jnp.float32)
        x2 = jax.random.normal(k2, (n, d), dtype=jnp.float32)
        gamma = jnp.ones((d,), dtype=jnp.float32)          # PyTorch LayerNorm default init
        beta = jnp.zeros((d,), dtype=jnp.float32)
        bound = 1.0 / (d ** 0.5)
        w1 = jax.random.uniform(k3, (dh, d), minval=-bound, maxval=bound, dtype=jnp.float32)
        b1 = jax.random.uniform(k4, (dh,), minval=-bound, maxval=bound, dtype=jnp.float32)
        w2 = jax.random.uniform(k5, (dh, d), minval=-bound, maxval=bound, dtype=jnp.float32)
        b2 = jax.random.uniform(k6, (dh,), minval=-bound, maxval=bound, dtype=jnp.float32)
        return x1, x2, gamma, beta, w1, b1, w2, b2

    key = jax.random.PRNGKey(0)
    # (8, 32)    : small demo shape (hidden_size=32, 8 feature vectors)
    # (16384, 32): exercises multi-tile online softmax + lane-dense phase B tiling
    # (1030, 32) : exercises row padding/masking + non-lane-dense fallback path
    for n, d in ((8, 32), (16384, 32), (1030, 32)):
        args = make_inputs(jax.random.fold_in(key, n), n, d)
        o1, o2 = simple_cross_attention(*args)
        jax.block_until_ready((o1, o2))
        r1, r2 = reference(*args)
        assert jnp.allclose(o1, r1, atol=2e-5, rtol=2e-5), f"x1_new mismatch (N={n})"
        assert jnp.allclose(o2, r2, atol=2e-5, rtol=2e-5), f"x2_new mismatch (N={n})"

    print("KERNEL_OK")
</pallas_src>

<mosaic_0001>
module attributes {stable_mosaic.version = 11 : i64} {
  func.func @_phase_a_kernel(%arg0: i32, %arg1: memref<8x32xf32, #tpu.memory_space<vmem>>, %arg2: memref<8x32xf32, #tpu.memory_space<vmem>>, %arg3: memref<1x32xf32, #tpu.memory_space<vmem>>, %arg4: memref<1x32xf32, #tpu.memory_space<vmem>>, %arg5: memref<32x8xf32, #tpu.memory_space<vmem>>, %arg6: memref<1x8xf32, #tpu.memory_space<vmem>>, %arg7: memref<32x8xf32, #tpu.memory_space<vmem>>, %arg8: memref<1x8xf32, #tpu.memory_space<vmem>>, %arg9: memref<1x32xf32, #tpu.memory_space<vmem>>, %arg10: memref<1x32xf32, #tpu.memory_space<vmem>>, %arg11: memref<1x1xf32, #tpu.memory_space<vmem>>, %arg12: memref<1x1xf32, #tpu.memory_space<vmem>>, %arg13: memref<1x32xf32, #tpu.memory_space<vmem>>, %arg14: memref<1x32xf32, #tpu.memory_space<vmem>>) attributes {dimension_semantics = [#tpu.dimension_semantics<arbitrary>], iteration_bounds = array<i64: 1>, scalar_prefetch = 0 : i64, scratch_operands = 4 : i64, tpu.core_type = #tpu.core_type<tc>, window_params = [{transform_indices = @transform_0, window_bounds = array<i64: 8, 32>}, {transform_indices = @transform_1, window_bounds = array<i64: 8, 32>}, {pipeline_mode = #tpu.pipeline_mode<synchronous>, transform_indices = @transform_2, window_bounds = array<i64: 1, 32>}, {pipeline_mode = #tpu.pipeline_mode<synchronous>, transform_indices = @transform_3, window_bounds = array<i64: 1, 32>}, {pipeline_mode = #tpu.pipeline_mode<synchronous>, transform_indices = @transform_4, window_bounds = array<i64: 32, 8>}, {pipeline_mode = #tpu.pipeline_mode<synchronous>, transform_indices = @transform_5, window_bounds = array<i64: 1, 8>}, {pipeline_mode = #tpu.pipeline_mode<synchronous>, transform_indices = @transform_6, window_bounds = array<i64: 32, 8>}, {pipeline_mode = #tpu.pipeline_mode<synchronous>, transform_indices = @transform_7, window_bounds = array<i64: 1, 8>}, {pipeline_mode = #tpu.pipeline_mode<synchronous>, transform_indices = @transform_8, window_bounds = array<i64: 1, 32>}, {pipeline_mode = #tpu.pipeline_mode<synchronous>, transform_indices = @transform_9, window_bounds = array<i64: 1, 32>}]} {
    %c0_i32 = arith.constant 0 : i32
    %0 = arith.cmpi eq, %arg0, %c0_i32 : i32
    %1 = arith.extui %0 : i1 to i32
    %c0_i32_0 = arith.constant 0 : i32
    %2 = arith.cmpi ne, %1, %c0_i32_0 : i32
    scf.if %2 {
      %cst_53 = arith.constant -1.000000e+30 : f32
      %112 = vector.broadcast %cst_53 : f32 to vector<1x1xf32>
      %c0_54 = arith.constant 0 : index
      %c0_55 = arith.constant 0 : index
      %113 = vector.load %arg11[%c0_54, %c0_55] : memref<1x1xf32, #tpu.memory_space<vmem>>, vector<1x1xf32>
      tpu.vector_store %arg11[%c0_54, %c0_55], %112 {strides = array<i32>} : memref<1x1xf32, #tpu.memory_space<vmem>>, vector<1x1xf32>,
      %cst_56 = arith.constant 0.000000e+00 : f32
      %114 = vector.broadcast %cst_56 : f32 to vector<1x1xf32>
      %c0_57 = arith.constant 0 : index
      %c0_58 = arith.constant 0 : index
      %115 = vector.load %arg12[%c0_57, %c0_58] : memref<1x1xf32, #tpu.memory_space<vmem>>, vector<1x1xf32>
      tpu.vector_store %arg12[%c0_57, %c0_58], %114 {strides = array<i32>} : memref<1x1xf32, #tpu.memory_space<vmem>>, vector<1x1xf32>,
      %cst_59 = arith.constant 0.000000e+00 : f32
      %116 = vector.broadcast %cst_59 : f32 to vector<1x32xf32>
      %c0_60 = arith.constant 0 : index
      %c0_61 = arith.constant 0 : index
      %117 = vector.load %arg13[%c0_60, %c0_61] : memref<1x32xf32, #tpu.memory_space<vmem>>, vector<1x32xf32>
      tpu.vector_store %arg13[%c0_60, %c0_61], %116 {strides = array<i32>} : memref<1x32xf32, #tpu.memory_space<vmem>>, vector<1x32xf32>,
      %cst_62 = arith.constant 0.000000e+00 : f32
      %118 = vector.broadcast %cst_62 : f32 to vector<1x32xf32>
      %c0_63 = arith.constant 0 : index
      %c0_64 = arith.constant 0 : index
      %119 = vector.load %arg14[%c0_63, %c0_64] : memref<1x32xf32, #tpu.memory_space<vmem>>, vector<1x32xf32>
      tpu.vector_store %arg14[%c0_63, %c0_64], %118 {strides = array<i32>} : memref<1x32xf32, #tpu.memory_space<vmem>>, vector<1x32xf32>,
    } else {
    }
    %c0 = arith.constant 0 : index
    %c0_1 = arith.constant 0 : index
    %3 = vector.load %arg1[%c0, %c0_1] : memref<8x32xf32, #tpu.memory_space<vmem>>, vector<8x32xf32>
    %c0_2 = arith.constant 0 : index
    %c0_3 = arith.constant 0 : index
    %4 = vector.load %arg2[%c0_2, %c0_3] : memref<8x32xf32, #tpu.memory_space<vmem>>, vector<8x32xf32>
    %c0_4 = arith.constant 0 : index
    %c0_5 = arith.constant 0 : index
    %5 = vector.load %arg3[%c0_4, %c0_5] : memref<1x32xf32, #tpu.memory_space<vmem>>, vector<1x32xf32>
    %c0_6 = arith.constant 0 : index
    %c0_7 = arith.constant 0 : index
    %6 = vector.load %arg4[%c0_6, %c0_7] : memref<1x32xf32, #tpu.memory_space<vmem>>, vector<1x32xf32>
    %cst = arith.constant dense<0.000000e+00> : vector<8xf32>
    %7 = vector.multi_reduction <add>, %3, %cst [1] : vector<8x32xf32> to vector<8xf32>
    %8 = vector.shape_cast %7 : vector<8xf32> to vector<8x1xf32>
    %cst_8 = arith.constant 3.200000e+01 : f32
    %9 = vector.broadcast %cst_8 : f32 to vector<8x1xf32>
    %10 = arith.divf %8, %9 : vector<8x1xf32>
    %11 = vector.broadcast %10 : vector<8x1xf32> to vector<8x32xf32>
    %12 = arith.subf %3, %11 : vector<8x32xf32>
    %13 = arith.mulf %12, %12 : vector<8x32xf32>
    %cst_9 = arith.constant dense<0.000000e+00> : vector<8xf32>
    %14 = vector.multi_reduction <add>, %13, %cst_9 [1] : vector<8x32xf32> to vector<8xf32>
    %15 = vector.shape_cast %14 : vector<8xf32> to vector<8x1xf32>
    %cst_10 = arith.constant 3.200000e+01 : f32
    %16 = vector.broadcast %cst_10 : f32 to vector<8x1xf32>
    %17 = arith.divf %15, %16 : vector<8x1xf32>
    %18 = vector.broadcast %10 : vector<8x1xf32> to vector<8x32xf32>
    %19 = arith.subf %3, %18 : vector<8x32xf32>
    %cst_11 = arith.constant 9.99999974E-6 : f32
    %20 = vector.broadcast %cst_11 : f32 to vector<8x1xf32>
    %21 = arith.addf %17, %20 : vector<8x1xf32>
    %22 = math.rsqrt %21 : vector<8x1xf32>
    %23 = vector.broadcast %22 : vector<8x1xf32> to vector<8x32xf32>
    %24 = arith.mulf %19, %23 : vector<8x32xf32>
    %25 = vector.broadcast %5 : vector<1x32xf32> to vector<8x32xf32>
    %26 = arith.mulf %24, %25 : vector<8x32xf32>
    %27 = vector.broadcast %6 : vector<1x32xf32> to vector<8x32xf32>
    %28 = arith.addf %26, %27 : vector<8x32xf32>
    %c0_12 = arith.constant 0 : index
    %c0_13 = arith.constant 0 : index
    %29 = vector.load %arg5[%c0_12, %c0_13] : memref<32x8xf32, #tpu.memory_space<vmem>>, vector<32x8xf32>
    %cst_14 = arith.constant dense<0.000000e+00> : vector<8x8xf32>
    %30 = tpu.matmul %28, %29, %cst_14 {dimension_numbers = #tpu.dot_dimension_numbers<[1], [0], [0], [1], [0, 0, 1, 1], [], []>} : vector<8x32xf32>, vector<32x8xf32>, vector<8x8xf32> -> vector<8x8xf32>
    %c0_15 = arith.constant 0 : index
    %c0_16 = arith.constant 0 : index
    %31 = vector.load %arg6[%c0_15, %c0_16] : memref<1x8xf32, #tpu.memory_space<vmem>>, vector<1x8xf32>
    %32 = vector.broadcast %31 : vector<1x8xf32> to vector<8x8xf32>
    %33 = arith.addf %30, %32 : vector<8x8xf32>
    %cst_17 = arith.constant dense<0.000000e+00> : vector<8xf32>
    %34 = vector.multi_reduction <add>, %4, %cst_17 [1] : vector<8x32xf32> to vector<8xf32>
    %35 = vector.shape_cast %34 : vector<8xf32> to vector<8x1xf32>
    %cst_18 = arith.constant 3.200000e+01 : f32
    %36 = vector.broadcast %cst_18 : f32 to vector<8x1xf32>
    %37 = arith.divf %35, %36 : vector<8x1xf32>
    %38 = vector.broadcast %37 : vector<8x1xf32> to vector<8x32xf32>
    %39 = arith.subf %4, %38 : vector<8x32xf32>
    %40 = arith.mulf %39, %39 : vector<8x32xf32>
    %cst_19 = arith.constant dense<0.000000e+00> : vector<8xf32>
    %41 = vector.multi_reduction <add>, %40, %cst_19 [1] : vector<8x32xf32> to vector<8xf32>
    %42 = vector.shape_cast %41 : vector<8xf32> to vector<8x1xf32>
    %cst_20 = arith.constant 3.200000e+01 : f32
    %43 = vector.broadcast %cst_20 : f32 to vector<8x1xf32>
    %44 = arith.divf %42, %43 : vector<8x1xf32>
    %45 = vector.broadcast %37 : vector<8x1xf32> to vector<8x32xf32>
    %46 = arith.subf %4, %45 : vector<8x32xf32>
    %cst_21 = arith.constant 9.99999974E-6 : f32
    %47 = vector.broadcast %cst_21 : f32 to vector<8x1xf32>
    %48 = arith.addf %44, %47 : vector<8x1xf32>
    %49 = math.rsqrt %48 : vector<8x1xf32>
    %50 = vector.broadcast %49 : vector<8x1xf32> to vector<8x32xf32>
    %51 = arith.mulf %46, %50 : vector<8x32xf32>
    %52 = vector.broadcast %5 : vector<1x32xf32> to vector<8x32xf32>
    %53 = arith.mulf %51, %52 : vector<8x32xf32>
    %54 = vector.broadcast %6 : vector<1x32xf32> to vector<8x32xf32>
    %55 = arith.addf %53, %54 : vector<8x32xf32>
    %c0_22 = arith.constant 0 : index
    %c0_23 = arith.constant 0 : index
    %56 = vector.load %arg7[%c0_22, %c0_23] : memref<32x8xf32, #tpu.memory_space<vmem>>, vector<32x8xf32>
    %cst_24 = arith.constant dense<0.000000e+00> : vector<8x8xf32>
    %57 = tpu.matmul %55, %56, %cst_24 {dimension_numbers = #tpu.dot_dimension_numbers<[1], [0], [0], [1], [0, 0, 1, 1], [], []>} : vector<8x32xf32>, vector<32x8xf32>, vector<8x8xf32> -> vector<8x8xf32>
    %c0_25 = arith.constant 0 : index
    %c0_26 = arith.constant 0 : index
    %58 = vector.load %arg8[%c0_25, %c0_26] : memref<1x8xf32, #tpu.memory_space<vmem>>, vector<1x8xf32>
    %59 = vector.broadcast %58 : vector<1x8xf32> to vector<8x8xf32>
    %60 = arith.addf %57, %59 : vector<8x8xf32>
    %61 = arith.mulf %33, %60 : vector<8x8xf32>
    %cst_27 = arith.constant dense<0.000000e+00> : vector<8xf32>
    %62 = vector.multi_reduction <add>, %61, %cst_27 [1] : vector<8x8xf32> to vector<8xf32>
    %63 = vector.shape_cast %62 : vector<8xf32> to vector<8x1xf32>
    %64 = arith.mulf %33, %33 : vector<8x8xf32>
    %cst_28 = arith.constant dense<0.000000e+00> : vector<8xf32>
    %65 = vector.multi_reduction <add>, %64, %cst_28 [1] : vector<8x8xf32> to vector<8xf32>
    %66 = vector.shape_cast %65 : vector<8xf32> to vector<8x1xf32>
    %67 = arith.mulf %60, %60 : vector<8x8xf32>
    %cst_29 = arith.constant dense<0.000000e+00> : vector<8xf32>
    %68 = vector.multi_reduction <add>, %67, %cst_29 [1] : vector<8x8xf32> to vector<8xf32>
    %69 = vector.shape_cast %68 : vector<8xf32> to vector<8x1xf32>
    %70 = arith.mulf %66, %69 : vector<8x1xf32>
    %cst_30 = arith.constant 9.99999996E-13 : f32
    %71 = vector.broadcast %cst_30 : f32 to vector<8x1xf32>
    %72 = arith.maximumf %70, %71 : vector<8x1xf32>
    %73 = math.rsqrt %72 : vector<8x1xf32>
    %74 = arith.mulf %63, %73 : vector<8x1xf32>
    %c0_31 = arith.constant 0 : index
    %c0_32 = arith.constant 0 : index
    %75 = vector.load %arg11[%c0_31, %c0_32] : memref<1x1xf32, #tpu.memory_space<vmem>>, vector<1x1xf32>
    %cst_33 = arith.constant dense<0xFF800000> : vector<1xf32>
    %76 = vector.multi_reduction <maximumf>, %74, %cst_33 [0] : vector<8x1xf32> to vector<1xf32>
    %77 = vector.shape_cast %76 : vector<1xf32> to vector<1x1xf32>
    %78 = arith.maximumf %75, %77 : vector<1x1xf32>
    %79 = arith.subf %75, %78 : vector<1x1xf32>
    %80 = math.exp %79 : vector<1x1xf32>
    %81 = vector.broadcast %78 : vector<1x1xf32> to vector<8x1xf32>
    %82 = arith.subf %74, %81 : vector<8x1xf32>
    %83 = math.exp %82 : vector<8x1xf32>
    %c0_34 = arith.constant 0 : index
    %c0_35 = arith.constant 0 : index
    %84 = vector.load %arg12[%c0_34, %c0_35] : memref<1x1xf32, #tpu.memory_space<vmem>>, vector<1x1xf32>
    %85 = arith.mulf %80, %84 : vector<1x1xf32>
    %cst_36 = arith.constant dense<0.000000e+00> : vector<1xf32>
    %86 = vector.multi_reduction <add>, %83, %cst_36 [0] : vector<8x1xf32> to vector<1xf32>
    %87 = vector.shape_cast %86 : vector<1xf32> to vector<1x1xf32>
    %88 = arith.addf %85, %87 : vector<1x1xf32>
    %c0_37 = arith.constant 0 : index
    %c0_38 = arith.constant 0 : index
    %89 = vector.load %arg12[%c0_37, %c0_38] : memref<1x1xf32, #tpu.memory_space<vmem>>, vector<1x1xf32>
    tpu.vector_store %arg12[%c0_37, %c0_38], %88 {strides = array<i32>} : memref<1x1xf32, #tpu.memory_space<vmem>>, vector<1x1xf32>,
    %c0_39 = arith.constant 0 : index
    %c0_40 = arith.constant 0 : index
    %90 = vector.load %arg13[%c0_39, %c0_40] : memref<1x32xf32, #tpu.memory_space<vmem>>, vector<1x32xf32>
    %91 = vector.broadcast %80 : vector<1x1xf32> to vector<1x32xf32>
    %92 = arith.mulf %91, %90 : vector<1x32xf32>
    %93 = vector.broadcast %83 : vector<8x1xf32> to vector<8x32xf32>
    %94 = arith.mulf %93, %3 : vector<8x32xf32>
    %cst_41 = arith.constant dense<0.000000e+00> : vector<32xf32>
    %95 = vector.multi_reduction <add>, %94, %cst_41 [0] : vector<8x32xf32> to vector<32xf32>
    %96 = vector.shape_cast %95 : vector<32xf32> to vector<1x32xf32>
    %97 = arith.addf %92, %96 : vector<1x32xf32>
    %c0_42 = arith.constant 0 : index
    %c0_43 = arith.constant 0 : index
    %98 = vector.load %arg13[%c0_42, %c0_43] : memref<1x32xf32, #tpu.memory_space<vmem>>, vector<1x32xf32>
    tpu.vector_store %arg13[%c0_42, %c0_43], %97 {strides = array<i32>} : memref<1x32xf32, #tpu.memory_space<vmem>>, vector<1x32xf32>,
    %c0_44 = arith.constant 0 : index
    %c0_45 = arith.constant 0 : index
    %99 = vector.load %arg14[%c0_44, %c0_45] : memref<1x32xf32, #tpu.memory_space<vmem>>, vector<1x32xf32>
    %100 = vector.broadcast %80 : vector<1x1xf32> to vector<1x32xf32>
    %101 = arith.mulf %100, %99 : vector<1x32xf32>
    %102 = vector.broadcast %83 : vector<8x1xf32> to vector<8x32xf32>
    %103 = arith.mulf %102, %4 : vector<8x32xf32>
    %cst_46 = arith.constant dense<0.000000e+00> : vector<32xf32>
    %104 = vector.multi_reduction <add>, %103, %cst_46 [0] : vector<8x32xf32> to vector<32xf32>
    %105 = vector.shape_cast %104 : vector<32xf32> to vector<1x32xf32>
    %106 = arith.addf %101, %105 : vector<1x32xf32>
    %c0_47 = arith.constant 0 : index
    %c0_48 = arith.constant 0 : index
    %107 = vector.load %arg14[%c0_47, %c0_48] : memref<1x32xf32, #tpu.memory_space<vmem>>, vector<1x32xf32>
    tpu.vector_store %arg14[%c0_47, %c0_48], %106 {strides = array<i32>} : memref<1x32xf32, #tpu.memory_space<vmem>>, vector<1x32xf32>,
    %c0_49 = arith.constant 0 : index
    %c0_50 = arith.constant 0 : index
    %108 = vector.load %arg11[%c0_49, %c0_50] : memref<1x1xf32, #tpu.memory_space<vmem>>, vector<1x1xf32>
    tpu.vector_store %arg11[%c0_49, %c0_50], %78 {strides = array<i32>} : memref<1x1xf32, #tpu.memory_space<vmem>>, vector<1x1xf32>,
    %c0_i32_51 = arith.constant 0 : i32
    %109 = arith.cmpi eq, %arg0, %c0_i32_51 : i32
    %110 = arith.extui %109 : i1 to i32
    %c0_i32_52 = arith.constant 0 : i32
    %111 = arith.cmpi ne, %110, %c0_i32_52 : i32
    scf.if %111 {
      %c0_53 = arith.constant 0 : index
      %c0_54 = arith.constant 0 : index
      %112 = vector.load %arg12[%c0_53, %c0_54] : memref<1x1xf32, #tpu.memory_space<vmem>>, vector<1x1xf32>
      %cst_55 = arith.constant 1.000000e+00 : f32
      %113 = vector.broadcast %cst_55 : f32 to vector<1x1xf32>
      %114 = arith.divf %113, %112 : vector<1x1xf32>
      %c0_56 = arith.constant 0 : index
      %c0_57 = arith.constant 0 : index
      %115 = vector.load %arg13[%c0_56, %c0_57] : memref<1x32xf32, #tpu.memory_space<vmem>>, vector<1x32xf32>
      %116 = vector.broadcast %114 : vector<1x1xf32> to vector<1x32xf32>
      %117 = arith.mulf %115, %116 : vector<1x32xf32>
      %c0_58 = arith.constant 0 : index
      %c0_59 = arith.constant 0 : index
      %118 = vector.load %arg9[%c0_58, %c0_59] : memref<1x32xf32, #tpu.memory_space<vmem>>, vector<1x32xf32>
      tpu.vector_store %arg9[%c0_58, %c0_59], %117 {strides = array<i32>} : memref<1x32xf32, #tpu.memory_space<vmem>>, vector<1x32xf32>,
      %c0_60 = arith.constant 0 : index
      %c0_61 = arith.constant 0 : index
      %119 = vector.load %arg14[%c0_60, %c0_61] : memref<1x32xf32, #tpu.memory_space<vmem>>, vector<1x32xf32>
      %120 = vector.broadcast %114 : vector<1x1xf32> to vector<1x32xf32>
      %121 = arith.mulf %119, %120 : vector<1x32xf32>
      %c0_62 = arith.constant 0 : index
      %c0_63 = arith.constant 0 : index
      %122 = vector.load %arg10[%c0_62, %c0_63] : memref<1x32xf32, #tpu.memory_space<vmem>>, vector<1x32xf32>
      tpu.vector_store %arg10[%c0_62, %c0_63], %121 {strides = array<i32>} : memref<1x32xf32, #tpu.memory_space<vmem>>, vector<1x32xf32>,
    } else {
    }
    return
  }
  func.func @transform_0(%arg0: i32) -> (i32, i32) {
    %c0_i32 = arith.constant 0 : i32
    %c0_i32_0 = arith.constant 0 : i32
    return %arg0, %c0_i32 : i32, i32
  }
  func.func @transform_1(%arg0: i32) -> (i32, i32) {
    %c0_i32 = arith.constant 0 : i32
    %c0_i32_0 = arith.constant 0 : i32
    return %arg0, %c0_i32 : i32, i32
  }
  func.func @transform_2(%arg0: i32) -> (i32, i32) {
    %c0_i32 = arith.constant 0 : i32
    %c0_i32_0 = arith.constant 0 : i32
    %c0_i32_1 = arith.constant 0 : i32
    return %c0_i32, %c0_i32_0 : i32, i32
  }
  func.func @transform_3(%arg0: i32) -> (i32, i32) {
    %c0_i32 = arith.constant 0 : i32
    %c0_i32_0 = arith.constant 0 : i32
    %c0_i32_1 = arith.constant 0 : i32
    return %c0_i32, %c0_i32_0 : i32, i32
  }
  func.func @transform_4(%arg0: i32) -> (i32, i32) {
    %c0_i32 = arith.constant 0 : i32
    %c0_i32_0 = arith.constant 0 : i32
    %c0_i32_1 = arith.constant 0 : i32
    return %c0_i32, %c0_i32_0 : i32, i32
  }
  func.func @transform_5(%arg0: i32) -> (i32, i32) {
    %c0_i32 = arith.constant 0 : i32
    %c0_i32_0 = arith.constant 0 : i32
    %c0_i32_1 = arith.constant 0 : i32
    return %c0_i32, %c0_i32_0 : i32, i32
  }
  func.func @transform_6(%arg0: i32) -> (i32, i32) {
    %c0_i32 = arith.constant 0 : i32
    %c0_i32_0 = arith.constant 0 : i32
    %c0_i32_1 = arith.constant 0 : i32
    return %c0_i32, %c0_i32_0 : i32, i32
  }
  func.func @transform_7(%arg0: i32) -> (i32, i32) {
    %c0_i32 = arith.constant 0 : i32
    %c0_i32_0 = arith.constant 0 : i32
    %c0_i32_1 = arith.constant 0 : i32
    return %c0_i32, %c0_i32_0 : i32, i32
  }
  func.func @transform_8(%arg0: i32) -> (i32, i32) {
    %c0_i32 = arith.constant 0 : i32
    %c0_i32_0 = arith.constant 0 : i32
    %c0_i32_1 = arith.constant 0 : i32
    return %c0_i32, %c0_i32_0 : i32, i32
  }
  func.func @transform_9(%arg0: i32) -> (i32, i32) {
    %c0_i32 = arith.constant 0 : i32
    %c0_i32_0 = arith.constant 0 : i32
    %c0_i32_1 = arith.constant 0 : i32
    return %c0_i32, %c0_i32_0 : i32, i32
  }
}

module attributes {stable_mosaic.version = 11 : i64} {
  func.func @_residual_add_kernel(%arg0: i32, %arg1: memref<1x128xf32, #tpu.memory_space<vmem>>, %arg2: memref<1x128xf32, #tpu.memory_space<vmem>>, %arg3: memref<2x128xf32, #tpu.memory_space<vmem>>, %arg4: memref<2x128xf32, #tpu.memory_space<vmem>>, %arg5: memref<2x128xf32, #tpu.memory_space<vmem>>, %arg6: memref<2x128xf32, #tpu.memory_space<vmem>>) attributes {dimension_semantics = [#tpu.dimension_semantics<parallel>], iteration_bounds = array<i64: 1>, scalar_prefetch = 0 : i64, scratch_operands = 0 : i64, tpu.core_type = #tpu.core_type<tc>, window_params = [{pipeline_mode = #tpu.pipeline_mode<synchronous>, transform_indices = @transform_0, window_bounds = array<i64: 1, 128>}, {pipeline_mode = #tpu.pipeline_mode<synchronous>, transform_indices = @transform_1, window_bounds = array<i64: 1, 128>}, {transform_indices = @transform_2, window_bounds = array<i64: 2, 128>}, {transform_indices = @transform_3, window_bounds = array<i64: 2, 128>}, {transform_indices = @transform_4, window_bounds = array<i64: 2, 128>}, {transform_indices = @transform_5, window_bounds = array<i64: 2, 128>}]} {
    %c0 = arith.constant 0 : index
    %c0_0 = arith.constant 0 : index
    %0 = vector.load %arg3[%c0, %c0_0] : memref<2x128xf32, #tpu.memory_space<vmem>>, vector<2x128xf32>
    %c0_1 = arith.constant 0 : index
    %c0_2 = arith.constant 0 : index
    %1 = vector.load %arg1[%c0_1, %c0_2] : memref<1x128xf32, #tpu.memory_space<vmem>>, vector<1x128xf32>
    %2 = vector.broadcast %1 : vector<1x128xf32> to vector<2x128xf32>
    %3 = arith.addf %0, %2 : vector<2x128xf32>
    %c0_3 = arith.constant 0 : index
    %c0_4 = arith.constant 0 : index
    %4 = vector.load %arg5[%c0_3, %c0_4] : memref<2x128xf32, #tpu.memory_space<vmem>>, vector<2x128xf32>
    tpu.vector_store %arg5[%c0_3, %c0_4], %3 {strides = array<i32>} : memref<2x128xf32, #tpu.memory_space<vmem>>, vector<2x128xf32>,
    %c0_5 = arith.constant 0 : index
    %c0_6 = arith.constant 0 : index
    %5 = vector.load %arg4[%c0_5, %c0_6] : memref<2x128xf32, #tpu.memory_space<vmem>>, vector<2x128xf32>
    %c0_7 = arith.constant 0 : index
    %c0_8 = arith.constant 0 : index
    %6 = vector.load %arg2[%c0_7, %c0_8] : memref<1x128xf32, #tpu.memory_space<vmem>>, vector<1x128xf32>
    %7 = vector.broadcast %6 : vector<1x128xf32> to vector<2x128xf32>
    %8 = arith.addf %5, %7 : vector<2x128xf32>
    %c0_9 = arith.constant 0 : index
    %c0_10 = arith.constant 0 : index
    %9 = vector.load %arg6[%c0_9, %c0_10] : memref<2x128xf32, #tpu.memory_space<vmem>>, vector<2x128xf32>
    tpu.vector_store %arg6[%c0_9, %c0_10], %8 {strides = array<i32>} : memref<2x128xf32, #tpu.memory_space<vmem>>, vector<2x128xf32>,
    return
  }
  func.func @transform_0(%arg0: i32) -> (i32, i32) {
    %c0_i32 = arith.constant 0 : i32
    %c0_i32_0 = arith.constant 0 : i32
    %c0_i32_1 = arith.constant 0 : i32
    return %c0_i32, %c0_i32_0 : i32, i32
  }
  func.func @transform_1(%arg0: i32) -> (i32, i32) {
    %c0_i32 = arith.constant 0 : i32
    %c0_i32_0 = arith.constant 0 : i32
    %c0_i32_1 = arith.constant 0 : i32
    return %c0_i32, %c0_i32_0 : i32, i32
  }
  func.func @transform_2(%arg0: i32) -> (i32, i32) {
    %c0_i32 = arith.constant 0 : i32
    %c0_i32_0 = arith.constant 0 : i32
    return %arg0, %c0_i32 : i32, i32
  }
  func.func @transform_3(%arg0: i32) -> (i32, i32) {
    %c0_i32 = arith.constant 0 : i32
    %c0_i32_0 = arith.constant 0 : i32
    return %arg0, %c0_i32 : i32, i32
  }
  func.func @transform_4(%arg0: i32) -> (i32, i32) {
    %c0_i32 = arith.constant 0 : i32
    %c0_i32_0 = arith.constant 0 : i32
    return %arg0, %c0_i32 : i32, i32
  }
  func.func @transform_5(%arg0: i32) -> (i32, i32) {
    %c0_i32 = arith.constant 0 : i32
    %c0_i32_0 = arith.constant 0 : i32
    return %arg0, %c0_i32 : i32, i32
  }
}

</mosaic_0001>

<bundles_post_ra>
// kernel: simple_cross_attention.3
= control target key start
LH: loop header
LB: loop body
LE: loop exit
PB: predicated region body
PF: predicated region fallthrough
CT: control target
= control target key end

     0   :  { %s97_s0 = inlined_call_operand.vmem [shape: f32[1,128], index: 0, kind: input, shape index: {}]   ;;  %s98_s2 = inlined_call_operand.vmem [shape: f32[2,128], index: 2, kind: input, shape index: {}, may-alias: {2,4}]   ;;  %s99_s1 = inlined_call_operand.vmem [shape: f32[1,128], index: 1, kind: input, shape index: {}]   ;;  %s100_s3 = inlined_call_operand.vmem [shape: f32[2,128], index: 3, kind: input, shape index: {}, may-alias: {3,5}]   ;;  %s101_s4 = inlined_call_operand.vmem [shape: f32[2,128], index: 4, kind: output, shape index: {0}, may-alias: {2,4}]   ;;  %s102_s5 = inlined_call_operand.vmem [shape: f32[2,128], index: 5, kind: output, shape index: {1}, may-alias: {3,5}]  }
   0x1   :  { %v19_v0 = vld [vmem:[%s98_s2] sm:$0x3] }
   0x2   :  { %v47_v1 = vld [vmem:[%s97_s0] ss:$0 sm:$0xff] }
   0x3   :  { %v29_v2 = vld [vmem:[%s100_s3] sm:$0x3]  ;;  %v27_v3 = vadd.f32 %v47_v1, %v19_v0 }
   0x4   :  { %v48_v4 = vld [vmem:[%s99_s1] ss:$0 sm:$0xff] }
   0x5   :  { %v37_v5 = vadd.f32 %v48_v4, %v29_v2  ;;  %28 = vst [vmem:[%s101_s4] sm:$0x3] %v27_v3 }
   0x7   :  { %38 = vst [vmem:[%s102_s5] sm:$0x3] %v37_v5 }

// kernel: simple_cross_attention.2
= control target key start
LH: loop header
LB: loop body
LE: loop exit
PB: predicated region body
PF: predicated region fallthrough
CT: control target
= control target key end

     0   :  { %vm45_vm0 = vcmask 261120   ;;  %vm35_vm1 = vcmask 0   ;;  %v445_v14 = vmov 0.0|0.0   ;;  %v446_v18 = vmov -1e+30   ;;  %s576_s0 = inlined_call_operand.vmem [shape: f32[8,32], index: 0, kind: input, shape index: {}]   ;;  %s577_s1 = inlined_call_operand.vmem [shape: f32[8,32], index: 1, kind: input, shape index: {}]   ;;  %s578_s4 = inlined_call_operand.vmem [shape: f32[32,8], index: 4, kind: input, shape index: {}]   ;;  %s579_s6 = inlined_call_operand.vmem [shape: f32[32,8], index: 6, kind: input, shape index: {}]   ;;  %s580_s2 = inlined_call_operand.vmem [shape: f32[1,32], index: 2, kind: input, shape index: {}]   ;;  %s581_s3 = inlined_call_operand.vmem [shape: f32[1,32], index: 3, kind: input, shape index: {}]   ;;  %s582_s5 = inlined_call_operand.vmem [shape: f32[1,8], index: 5, kind: input, shape index: {}]   ;;  %s583_s7 = inlined_call_operand.vmem [shape: f32[1,8], index: 7, kind: input, shape index: {}]   ;;  %s584_s8 = inlined_call_operand.vmem [shape: f32[1,32], index: 8, kind: output, shape index: {0}]   ;;  %s585_s9 = inlined_call_operand.vmem [shape: f32[1,32], index: 9, kind: output, shape index: {1}]  }
   0x1   :  { %v503_v0 = vld [vmem:[%s576_s0] sm:$0xff]  ;;  %414 = vmatprep.subr.bf16.mxu0 %v445_v14  ;;  %v75_v16 = vld [vmem:[%s578_s4 + $0x8] sm:$0xff]  ;;  %420 = vmatprep.subr.bf16.mxu1 %v445_v14  ;;  %v76_v17 = vld [vmem:[%s578_s4 + $0x10] sm:$0xff]  ;;  %36 = vst.msk [vmem:[#allocation2] sm:$0x1] %vm35_vm1, %v446_v18  ;;  %v447_v19 = vmov 0.0  }
   0x2   :  { %v508_v1 = vld [vmem:[%s577_s1] sm:$0xff]  ;;  %v46_v2 = vsel %vm45_vm0, %v503_v0, 0.0  ;;  %37 = vst.msk [vmem:[#allocation3] sm:$0x1] %vm35_vm1, %v447_v19  ;;  %vm38_vm2 = vcmask 253952   ;;  %v77_v21 = vld [vmem:[%s578_s4 + $0x18] sm:$0xff] }
   0x3   :  { %47 = vadd.xlane.f32.xlu0 %v46_v2  ;;  %v158_v3 = vsel %vm45_vm0, %v508_v1, 0.0  ;;  %v74_v15 = vld [vmem:[%s578_s4] sm:$0xff]  ;;  %v174_v23 = vld [vmem:[%s579_s6 + $0x8] sm:$0xff]  ;;  %39 = vst.msk [vmem:[#allocation4] sm:$0x1] %vm38_vm2, %v447_v19  ;;  %vm448_vm3 = vmmov 0   ;;  %v418_v25 = vpack.c.bf16 %v77_v21, %v76_v17 }
   0x4   :  { %v415_v20 = vpack.c.bf16 %v75_v16, %v74_v15  ;;  %v173_v22 = vld [vmem:[%s579_s6] sm:$0xff]  ;;  %40 = vst.msk [vmem:[#allocation5] sm:$0x1] %vm38_vm2, %v447_v19  ;;  %400 = vmatprep.mubr.msk.f32.mxu0 %vm448_vm3, %v447_v19  ;;  %411 = vmatprep.mubr.msk.f32.mxu1 %vm448_vm3, %v447_v19  ;;  %v175_v26 = vld [vmem:[%s579_s6 + $0x10] sm:$0xff]  ;;  %v176_v27 = vld [vmem:[%s579_s6 + $0x18] sm:$0xff]  ;;  %vm258_vm4 = vcmask 64512  }
   0x5   :  { %v421_v24 = vpack.c.bf16 %v174_v23, %v173_v22  ;;  %v424_v28 = vpack.c.bf16 %v176_v27, %v175_v26  ;;  %v376_v36 = vld [vmem:[%s580_s2] ss:$0 sm:$0xff]  ;;  %v449_v59 = vmov 0   ;;  %vm296_vm5 = vcmask 7168  }
   0x6   :  { %416 = vmatpush3.bf16.msra.mxu0 %v415_v20  ;;  %v377_v38 = vld [vmem:[%s581_s3] ss:$0 sm:$0xff]  ;;  %432 = vset.pattern.permute.xlu0 %v449_v59 }
   0x7   :  { %159 = vadd.xlane.f32.xlu0 %v158_v3  ;;  %417 = vmatprep.subr.bf16.mxu0 %v445_v14  ;;  %v378_v45 = vld [vmem:[%s582_s5] ss:$0 sm:$0xff] }
   0x8   :  { %422 = vmatpush3.bf16.msra.mxu1 %v421_v24  ;;  %v380_v49 = vld [vmem:[%s583_s7] ss:$0 sm:$0xff]  ;;  %431 = vset.pattern.permute.xlu1 %v449_v59 }
   0x9   :  { %423 = vmatprep.subr.bf16.mxu1 %v445_v14 }
   0xa   :  { %419 = vmatpush3.bf16.msra.mxu0 %v418_v25 }
   0xc   :  { %425 = vmatpush3.bf16.msra.mxu1 %v424_v28  ;;  %v294_v28 = vld [vmem:[#allocation3] sm:$0x1] }
  0x90   :  { %v48_v4 = vpop.xlane.xlu0 %47 }
  0x91   :  { %v50_v5 = vmul.f32 0.03125, %v48_v4 }
  0x93   :  { %v51_v6 = vsub.f32 %v503_v0, %v50_v5 }
  0x94   :  { %v160_v7 = vpop.xlane.xlu0 %159 }
  0x95   :  { %v161_v8 = vmul.f32 0.03125, %v160_v7  ;;  %v52_v9 = vmul.f32 %v51_v6, %v51_v6 }
  0x97   :  { %v162_v10 = vsub.f32 %v508_v1, %v161_v8  ;;  %v53_v11 = vsel %vm45_vm0, %v52_v9, 0.0 }
  0x98   :  { %54 = vadd.xlane.f32.xlu1 %v53_v11 }
  0x99   :  { %v163_v12 = vmul.f32 %v162_v10, %v162_v10 }
  0x9b   :  { %v164_v13 = vsel %vm45_vm0, %v163_v12, 0.0  ;;  %v274_v12 = vld [vmem:[#allocation2] sm:$0x1] }
  0x9c   :  { %165 = vadd.xlane.f32.xlu1 %v164_v13 }
 0x125   :  { %v55_v29 = vpop.xlane.xlu1 %54 }
 0x126   :  { %v56_v30 = vmul.f32 0.03125, %v55_v29 }
 0x128   :  { %v57_v31 = vadd.f32 1e-05, %v56_v30 }
 0x129   :  { %v166_v32 = vpop.xlane.xlu1 %165 }
 0x12a   :  { %433 = vrsqrt.f32 %v57_v31  ;;  %v167_v33 = vmul.f32 0.03125, %v166_v32 }
 0x12c   :  { %v168_v34 = vadd.f32 1e-05, %v167_v33 }
 0x12e   :  { %435 = vrsqrt.f32 %v168_v34 }
 0x134   :  { %v434_v35 = vpop.eup %433 }
 0x135   :  { %v59_v37 = vmul.f32 %v434_v35, %v51_v6  ;;  %v286_v6 = vlaneseq }
 0x137   :  { %v66_v39 = vmul.f32 %v376_v36, %v59_v37  ;;  %v287_v9 = vshrl.u32 %v286_v6, 7 }
 0x138   :  { %v436_v40 = vpop.eup %435 }
 0x139   :  { %v73_v41 = vadd.f32 %v377_v38, %v66_v39  ;;  %v170_v42 = vmul.f32 %v436_v40, %v162_v10  ;;  %v288_v13 = vsub.s32 0, %v287_v9 }
 0x13b   :  { %401 = vmatmul.mubr.msk.f32.vlgmr.msra.gmra.mrb[0].mxu0 %vm45_vm0, %v73_v41  ;;  %v171_v43 = vmul.f32 %v376_v36, %v170_v42 }
 0x13d   :  { %v172_v44 = vadd.f32 %v377_v38, %v171_v43 }
 0x13f   :  { %412 = vmatmul.mubr.msk.f32.vlgmr.msra.gmra.mrb[0].mxu1 %vm45_vm0, %v172_v44 }
 0x20e   :  { %v154_v46 = vpop.f32.mrb[0].mxu0 }
 0x20f   :  { %v155_v47 = vadd.f32 %v378_v45, %v154_v46  ;;  %v402_v48 = vpop.f32.mrb[1].mxu0 }
 0x211   :  { %v262_v50 = vmul.f32 %v155_v47, %v155_v47 }
 0x212   :  { %v253_v51 = vpop.f32.mrb[0].mxu1 }
 0x213   :  { %v254_v52 = vadd.f32 %v380_v49, %v253_v51  ;;  %v413_v53 = vpop.f32.mrb[1].mxu1  ;;  %v263_v54 = vsel %vm258_vm4, %v262_v50, 0.0  ;;  %v307_v50 = vld [vmem:[#allocation4] sm:$0x1]  ;;  %v334_v51 = vld [vmem:[#allocation5] sm:$0x1] }
 0x214   :  { %264 = vadd.xlane.f32.xlu0 %v263_v54 }
 0x215   :  { %v266_v55 = vmul.f32 %v254_v52, %v254_v52  ;;  %v257_v56 = vmul.f32 %v254_v52, %v155_v47 }
 0x217   :  { %v267_v57 = vsel %vm258_vm4, %v266_v55, 0.0  ;;  %v259_v58 = vsel %vm258_vm4, %v257_v56, 0.0 }
 0x218   :  { %268 = vadd.xlane.f32.xlu1 %v267_v57  ;;  %260 = vadd.xlane.f32.xlu0 %v259_v58 }
 0x2a1   :  { %v265_v60 = vpop.xlane.xlu0 %264 }
 0x2a5   :  { %v269_v61 = vpop.xlane.xlu1 %268  ;;  %v261_v3 = vpop.xlane.xlu0 %260 }
 0x2a6   :  { %v270_v62 = vmul.f32 %v269_v61, %v265_v60 }
 0x2a8   :  { %v271_v63 = vmax.f32 %v270_v62, 1e-12 }
 0x2aa   :  { %437 = vrsqrt.f32 %v271_v63 }
 0x2b4   :  { %v438_v2 = vpop.eup %437 }
 0x2b5   :  { %v273_v4 = vmul.f32 %v438_v2, %v261_v3 }
 0x2b7   :  { %v275_v5 = vrot.slane %v273_v4, 4 }
 0x2b9   :  { %v276_v7 = vmax.f32 %v273_v4, %v275_v5 }
 0x2bb   :  { %v277_v8 = vrot.slane %v276_v7, 2 }
 0x2bd   :  { %v278_v10 = vmax.f32 %v276_v7, %v277_v8 }
 0x2bf   :  { %v279_v11 = vrot.slane %v278_v10, 1 }
 0x2c1   :  { %v280_v14 = vmax.f32 %v278_v10, %v279_v11 }
 0x2c3   :  { %v281_v15 = vmax.f32 %v274_v12, %v280_v14 }
 0x2c5   :  { %v282_v16 = vsub.f32 %v274_v12, %v281_v15  ;;  %v289_v17 = vrot.slane %v281_v15, %v288_v13  ;;  %346 = vst.msk [vmem:[#allocation2] sm:$0x1] %vm35_vm1, %v281_v15 }
 0x2c7   :  { %v283_v18 = vmul.f32 1.442695, %v282_v16  ;;  %v291_v19 = vsub.f32 %v273_v4, %v289_v17 }
 0x2c9   :  { %439 = vpow2.f32 %v283_v18  ;;  %v292_v20 = vmul.f32 1.442695, %v291_v19 }
 0x2cb   :  { %441 = vpow2.f32 %v292_v20 }
 0x2d3   :  { %v440_v21 = vpop.eup %439 }
 0x2d4   :  { %310 = vperm.xlu0 %432, %v440_v21   ;;  %v295_v30 = vmul.f32 %v440_v21, %v294_v28 }
 0x2d5   :  { %v442_v22 = vpop.eup %441 }
 0x2d6   :  { %v297_v23 = vsel %vm296_vm5, %v442_v22, 0.0  ;;  %320 = vperm.xlu1 %431, %v442_v22  }
 0x2d7   :  { %v298_v24 = vrot.slane %v297_v23, 4 }
 0x2d9   :  { %v299_v25 = vadd.f32 %v298_v24, %v297_v23 }
 0x2db   :  { %v300_v26 = vrot.slane %v299_v25, 2 }
 0x2dd   :  { %v301_v27 = vadd.f32 %v300_v26, %v299_v25 }
 0x2df   :  { %v302_v29 = vrot.slane %v301_v27, 1 }
 0x2e1   :  { %v303_v31 = vadd.f32 %v302_v29, %v301_v27 }
 0x2e3   :  { %v304_v32 = vadd.f32 %v303_v31, %v295_v30 }
 0x2e5   :  { %306 = vst.msk [vmem:[#allocation3] sm:$0x1] %vm35_vm1, %v304_v32 }
 0x2ec   :  { %v350_v33 = vld [vmem:[#allocation3] sm:$0x1] }
 0x2ed   :  { %443 = vrcp.f32 %v350_v33 }
 0x2f7   :  { %v444_v34 = vpop.eup %443 }
 0x2f8   :  { %356 = vperm.xlu1 %431, %v444_v34  }
 0x353   :  { %v311_v44 = vpop.permute.xlu0 %310 }
 0x354   :  { %v316_v47 = vrot.slane %v311_v44, %v288_v13 }
 0x355   :  { %v321_v35 = vpop.permute.xlu1 %320 }
 0x356   :  { %v323_v36 = vmul.f32 %v321_v35, %v503_v0  ;;  %v336_v37 = vmul.f32 %v321_v35, %v508_v1  ;;  %v317_v53 = vmul.f32 %v316_v47, %v307_v50  ;;  %v335_v1 = vmul.f32 %v334_v51, %v316_v47 }
 0x358   :  { %v324_v38 = vsel %vm45_vm0, %v323_v36, 0.0  ;;  %v337_v39 = vsel %vm45_vm0, %v336_v37, 0.0 }
 0x359   :  { %v325_v40 = vrot.slane %v324_v38, 4  ;;  %v338_v41 = vrot.slane %v337_v39, 4 }
 0x35b   :  { %v326_v42 = vadd.f32 %v325_v40, %v324_v38  ;;  %v339_v43 = vadd.f32 %v338_v41, %v337_v39 }
 0x35d   :  { %v327_v45 = vrot.slane %v326_v42, 2  ;;  %v340_v46 = vrot.slane %v339_v43, 2 }
 0x35f   :  { %v328_v48 = vadd.f32 %v327_v45, %v326_v42  ;;  %v341_v49 = vadd.f32 %v340_v46, %v339_v43 }
 0x361   :  { %v329_v52 = vrot.slane %v328_v48, 1  ;;  %v342_v0 = vrot.slane %v341_v49, 1 }
 0x363   :  { %v330_v54 = vadd.f32 %v329_v52, %v328_v48  ;;  %v343_v55 = vadd.f32 %v342_v0, %v341_v49 }
 0x365   :  { %v331_v56 = vadd.f32 %v330_v54, %v317_v53  ;;  %v344_v57 = vadd.f32 %v343_v55, %v335_v1 }
 0x367   :  { %333 = vst.msk [vmem:[#allocation4] sm:$0x1] %vm38_vm2, %v331_v56  ;;  %345 = vst.msk [vmem:[#allocation5] sm:$0x1] %vm38_vm2, %v344_v57 }
 0x36e   :  { %v353_v60 = vld [vmem:[#allocation4] sm:$0x1]  ;;  %v365_v61 = vld [vmem:[#allocation5] sm:$0x1] }
 0x377   :  { %v357_v58 = vpop.permute.xlu1 %356 }
 0x378   :  { %v362_v59 = vrot.slane %v357_v58, %v288_v13 }
 0x37a   :  { %v363_v62 = vmul.f32 %v362_v59, %v353_v60  ;;  %v366_v63 = vmul.f32 %v365_v61, %v362_v59 }
 0x37c   :  { %364 = vst.msk [vmem:[%s584_s8] sm:$0x1] %vm38_vm2, %v363_v62  ;;  %367 = vst.msk [vmem:[%s585_s9] sm:$0x1] %vm38_vm2, %v366_v63 }

</bundles_post_ra>
